<compile_context>
chip_gen: v6e
topology: v6e:2x2x1
jax: 0.10.0
libtpu: 0.0.40
codegen_flags: <defaults>
</compile_context>

<pallas_src>
import functools

import jax
import jax.numpy as jnp
import numpy as np
from jax.experimental import pallas as pl
from jax.experimental.pallas import tpu as pltpu


def _ldam_loss_kernel(logits_ref, target_ref, sm_ref, out_ref, acc_ref, *,
                      s, n_valid, tile_n, blocks_per_core):
    core = pl.program_id(0)      # row-range split across TensorCores (v7x)
    i = pl.program_id(1)         # row-block index within this core's range
    nsteps = pl.num_programs(1)

    # Cast in-kernel: the HBM->VMEM DMA moves the narrow dtype.
    logits = logits_ref[...].astype(jnp.float32)   # (TILE_N, C)
    tgt = target_ref[...]                          # (TILE_N, 1) i32
    s_m = sm_ref[...]                              # (1, C) f32 == s * m_list

    tn, cdim = logits.shape

    # Bool true-class mask (replaces the f32 one-hot: no cast, no extra mul).
    cols = jax.lax.broadcasted_iota(jnp.int32, (tn, cdim), 1)
    mask = cols == tgt                              # (TILE_N, C) bool

    # z = s * (logits - onehot * m)  with  s*m  folded host-side.
    z = s * logits - jnp.where(mask, s_m, 0.0)      # (TILE_N, C)
    z_max = jnp.max(z, axis=1, keepdims=True)       # (TILE_N, 1)
    # TODO(synk): optionally exp in bf16 on v6e/v7x if an xprof trace shows the
    # EUP slot binding after the DMA fixes (relaxes accuracy slightly).
    lse = jnp.log(jnp.sum(jnp.exp(z - z_max), axis=1, keepdims=True)) + z_max
    z_true = jnp.sum(jnp.where(mask, z, 0.0), axis=1, keepdims=True)
    per_sample = lse - z_true                       # (TILE_N, 1)

    # Zero rows beyond the true batch size: tail of the last block and any
    # clamped duplicate blocks on the trailing core's range.
    row_start = (core * blocks_per_core + i) * tile_n
    rows = row_start + jax.lax.broadcasted_iota(jnp.int32, (tn, 1), 0)
    per_sample = jnp.where(rows < n_valid, per_sample, 0.0)

    # Accumulate in VMEM (one VPU add per step, hides under the DMA); the
    # cross-sublane reduce + scalar SMEM store run once per core range.
    @pl.when(i == 0)
    def _():
        acc_ref[...] = jnp.zeros_like(acc_ref)

    acc_ref[...] += per_sample

    @pl.when(i == nsteps - 1)
    def _():
        out_ref[0, 0] = jnp.sum(acc_ref[...])


def _num_tensorcores():
    """2 TensorCores per chip on v7x, 1 on v5e/v6e (and as a safe fallback)."""
    try:
        kind = jax.devices()[0].device_kind.lower()
    except Exception:
        return 1
    return 2 if "v7" in kind else 1


def _sublane_multiple(dtype):
    itemsize = max(1, jnp.dtype(dtype).itemsize)
    return max(8, 32 // itemsize)        # 8 for f32, 16 for bf16, 32 for int8


def _vmem_footprint(tile_n, c_pad, dtype_bytes):
    logits_b = 2 * tile_n * c_pad * dtype_bytes     # double-buffered logits
    target_b = 2 * tile_n * 128 * 4                 # (tile_n,1) i32, lane-padded
    acc_b = tile_n * 128 * 4                        # (tile_n,1) f32 scratch
    m_b = 2 * c_pad * 4                             # resident s*margin row
    return logits_b + target_b + acc_b + m_b


def _choose_tile_n(n, c, dtype):
    dtype_bytes = jnp.dtype(dtype).itemsize
    sub = _sublane_multiple(dtype)
    c_pad = -(-c // 128) * 128                      # lane padding in VMEM
    n_pad = -(-n // sub) * sub

    # ~4 MiB of (lane-padded) logits per tile keeps the ~0.35 us per-step
    # overhead at a few percent of the DMA time for realistic C.
    target_logits_bytes = 4 * 1024 * 1024
    t = target_logits_bytes // (c_pad * dtype_bytes)

    # Cap the full double-buffered footprint at ~24 MiB (fits v7x's 64 MiB
    # physical VMEM with room to spare; vmem_limit_bytes is raised to match).
    budget = 24 * 1024 * 1024
    per_row = 2 * c_pad * dtype_bytes + 2 * 128 * 4 + 128 * 4
    const = 2 * c_pad * 4
    t = min(t, max(sub, (budget - const) // per_row))

    t = min(t, n_pad)
    t = max(sub, (t // sub) * sub)
    return int(t)


def ldam_loss(logits, target, cls_num_list, max_m=0.5, s=30.0, tile_n=None):
    """JAX/Pallas equivalent of LDAMLoss.forward.

    logits: (N, C) float32 or bfloat16, target: (N,) int. Returns scalar f32.
    """
    # Per-class margins (host-side, matches the module's __init__); fold the
    # scale s into the margin row so the kernel never multiplies it again.
    cls_num = np.asarray(cls_num_list, dtype=np.float64)
    m_list = 1.0 / np.sqrt(np.sqrt(cls_num))
    m_list = m_list * (max_m / np.max(m_list))
    s_m = jnp.asarray(float(s) * m_list, dtype=jnp.float32)

    n, c = logits.shape
    in_dtype = logits.dtype                          # no wrapper up-cast
    dtype_bytes = jnp.dtype(in_dtype).itemsize
    sub = _sublane_multiple(in_dtype)

    target_2d = target.astype(jnp.int32).reshape(n, 1)
    s_m_2d = s_m.reshape(1, c)

    if tile_n is None:
        tile_n = _choose_tile_n(n, c, in_dtype)
    else:
        tile_n = max(sub, (int(tile_n) // sub) * sub)

    c_pad = -(-c // 128) * 128
    vmem_limit = int(_vmem_footprint(tile_n, c_pad, dtype_bytes) + (8 << 20))

    num_cores = _num_tensorcores()
    nblocks = pl.cdiv(n, tile_n)                    # total row blocks
    bpc = pl.cdiv(nblocks, num_cores)               # row blocks per core
    last_block = nblocks - 1

    if num_cores == 1:
        def row_block(core, i):                     # no clamp needed
            return i
    else:
        def row_block(core, i):
            # Out-of-range blocks on the trailing core are clamped; their rows
            # are fully masked inside the kernel (row index >= n_valid).
            return jnp.minimum(core * bpc + i, last_block)

    kernel = functools.partial(
        _ldam_loss_kernel, s=float(s), n_valid=n, tile_n=tile_n,
        blocks_per_core=bpc)

    cost = pl.CostEstimate(
        flops=10 * n * c,
        transcendentals=n * c,
        bytes_accessed=n * c * dtype_bytes + n * 4 + c * 4 + num_cores * 4)

    partial_sums = pl.pallas_call(
        kernel,
        out_shape=jax.ShapeDtypeStruct((num_cores, 1), jnp.float32),
        grid=(num_cores, bpc),
        in_specs=[
            # logits: streamed row tiles in their original dtype
            pl.BlockSpec((tile_n, c), lambda core, i: (row_block(core, i), 0)),
            # targets: matching row tiles (lane-padded in VMEM; budgeted above)
            pl.BlockSpec((tile_n, 1), lambda core, i: (row_block(core, i), 0)),
            # s*margins: constant block index -> DMA'd once, stays resident
            pl.BlockSpec((1, c), lambda core, i: (0, 0)),
        ],
        # per-core scalar partial sum on the scalar path
        out_specs=pl.BlockSpec((1, 1), lambda core, i: (core, 0),
                               memory_space=pltpu.MemorySpace.SMEM),
        scratch_shapes=[pltpu.VMEM((tile_n, 1), jnp.float32)],
        compiler_params=pltpu.CompilerParams(
            # TODO(synk): on v7x verify via xprof that the leading axis really
            # shards across both TensorCores; switch to CORE_PARALLEL if not.
            dimension_semantics=("parallel", "arbitrary"),
            vmem_limit_bytes=vmem_limit),
        cost_estimate=cost,
    )(logits, target_2d, s_m_2d)

    return jnp.sum(partial_sums) / jnp.float32(n)


def _ldam_loss_ref(logits, target, cls_num_list, max_m=0.5, s=30.0):
    """Pure-JAX reference for validation (compute in f32)."""
    cls_num = np.asarray(cls_num_list, dtype=np.float64)
    m_list = 1.0 / np.sqrt(np.sqrt(cls_num))
    m_list = m_list * (max_m / np.max(m_list))
    m_list = jnp.asarray(m_list, dtype=jnp.float32)

    n, c = logits.shape
    x = logits.astype(jnp.float32)
    onehot = jax.nn.one_hot(target, c, dtype=jnp.float32)
    z = s * (x - onehot * m_list[None, :])
    logp = jax.nn.log_softmax(z, axis=-1)
    return -jnp.mean(jnp.sum(onehot * logp, axis=-1))


if __name__ == "__main__":
    key = jax.random.PRNGKey(0)

    # --- case 1: tiny shapes matching the module's typical use (f32) -------
    k1, k2, key = jax.random.split(key, 3)
    batch, num_classes = 8, 4
    cls_num_list = [100, 200, 50, 400]
    logits = jax.random.normal(k1, (batch, num_classes), dtype=jnp.float32)
    target = jax.random.randint(k2, (batch,), 0, num_classes, dtype=jnp.int32)
    loss = jax.block_until_ready(ldam_loss(logits, target, cls_num_list))
    ref = jax.block_until_ready(_ldam_loss_ref(logits, target, cls_num_list))
    np.testing.assert_allclose(np.asarray(loss), np.asarray(ref),
                               rtol=5e-5, atol=5e-5)

    # --- case 2: bf16 logits streamed without up-cast + ragged tail rows ---
    k1, k2, key = jax.random.split(key, 3)
    batch, num_classes = 300, 256
    cls_num_list2 = (np.arange(num_classes) % 7 + 1) * 10
    logits = jax.random.normal(k1, (batch, num_classes)).astype(jnp.bfloat16)
    target = jax.random.randint(k2, (batch,), 0, num_classes, dtype=jnp.int32)
    loss = jax.block_until_ready(ldam_loss(logits, target, cls_num_list2))
    ref = jax.block_until_ready(_ldam_loss_ref(logits, target, cls_num_list2))
    np.testing.assert_allclose(np.asarray(loss), np.asarray(ref),
                               rtol=5e-5, atol=5e-5)

    # --- case 3: forced small tile -> multiple row blocks + tail masking ---
    k1, k2, key = jax.random.split(key, 3)
    batch, num_classes = 1050, 128
    cls_num_list3 = (np.arange(num_classes) % 5 + 1) * 25
    logits = jax.random.normal(k1, (batch, num_classes), dtype=jnp.float32)
    target = jax.random.randint(k2, (batch,), 0, num_classes, dtype=jnp.int32)
    loss = jax.block_until_ready(
        ldam_loss(logits, target, cls_num_list3, tile_n=128))
    ref = jax.block_until_ready(_ldam_loss_ref(logits, target, cls_num_list3))
    np.testing.assert_allclose(np.asarray(loss), np.asarray(ref),
                               rtol=5e-5, atol=5e-5)

    print("KERNEL_OK")
</pallas_src>

<mosaic_0001>
module attributes {stable_mosaic.version = 11 : i64} {
  func.func @_ldam_loss_kernel(%arg0: i32, %arg1: i32, %arg2: memref<8x4xf32, #tpu.memory_space<vmem>>, %arg3: memref<8x1xi32, #tpu.memory_space<vmem>>, %arg4: memref<1x4xf32, #tpu.memory_space<vmem>>, %arg5: memref<1x1xf32, #tpu.memory_space<smem>>, %arg6: memref<8x1xf32, #tpu.memory_space<vmem>>) attributes {dimension_semantics = [#tpu.dimension_semantics<parallel>, #tpu.dimension_semantics<arbitrary>], iteration_bounds = array<i64: 1, 1>, scalar_prefetch = 0 : i64, scratch_operands = 1 : i64, tpu.core_type = #tpu.core_type<tc>, window_params = [{transform_indices = @transform_0, window_bounds = array<i64: 8, 4>}, {transform_indices = @transform_1, window_bounds = array<i64: 8, 1>}, {pipeline_mode = #tpu.pipeline_mode<synchronous>, transform_indices = @transform_2, window_bounds = array<i64: 1, 4>}, {transform_indices = @transform_3, window_bounds = array<i64: 1, 1>}]} {
    %c0 = arith.constant 0 : index
    %c0_0 = arith.constant 0 : index
    %0 = vector.load %arg2[%c0, %c0_0] : memref<8x4xf32, #tpu.memory_space<vmem>>, vector<8x4xf32>
    %c0_1 = arith.constant 0 : index
    %c0_2 = arith.constant 0 : index
    %1 = vector.load %arg3[%c0_1, %c0_2] : memref<8x1xi32, #tpu.memory_space<vmem>>, vector<8x1xi32>
    %c0_3 = arith.constant 0 : index
    %c0_4 = arith.constant 0 : index
    %2 = vector.load %arg4[%c0_3, %c0_4] : memref<1x4xf32, #tpu.memory_space<vmem>>, vector<1x4xf32>
    %3 = tpu.iota {dimensions = array<i32: 1>} : vector<8x4xi32>
    %4 = vector.broadcast %1 : vector<8x1xi32> to vector<8x4xi32>
    %5 = arith.cmpi eq, %3, %4 : vector<8x4xi32>
    %cst = arith.constant 3.000000e+01 : f32
    %6 = vector.broadcast %cst : f32 to vector<8x4xf32>
    %7 = arith.mulf %6, %0 : vector<8x4xf32>
    %cst_5 = arith.constant 0.000000e+00 : f32
    %8 = vector.shape_cast %2 : vector<1x4xf32> to vector<1x4xf32>
    %9 = vector.broadcast %8 : vector<1x4xf32> to vector<8x4xf32>
    %10 = vector.broadcast %cst_5 : f32 to vector<8x4xf32>
    %11 = arith.select %5, %9, %10 : vector<8x4xi1>, vector<8x4xf32>
    %12 = arith.subf %7, %11 : vector<8x4xf32>
    %cst_6 = arith.constant dense<0xFF800000> : vector<8xf32>
    %13 = vector.multi_reduction <maximumf>, %12, %cst_6 [1] : vector<8x4xf32> to vector<8xf32>
    %14 = vector.shape_cast %13 : vector<8xf32> to vector<8x1xf32>
    %15 = vector.broadcast %14 : vector<8x1xf32> to vector<8x4xf32>
    %16 = arith.subf %12, %15 : vector<8x4xf32>
    %17 = math.exp %16 : vector<8x4xf32>
    %cst_7 = arith.constant dense<0.000000e+00> : vector<8xf32>
    %18 = vector.multi_reduction <add>, %17, %cst_7 [1] : vector<8x4xf32> to vector<8xf32>
    %19 = vector.shape_cast %18 : vector<8xf32> to vector<8x1xf32>
    %20 = math.log %19 : vector<8x1xf32>
    %21 = arith.addf %20, %14 : vector<8x1xf32>
    %cst_8 = arith.constant 0.000000e+00 : f32
    %22 = vector.broadcast %cst_8 : f32 to vector<8x4xf32>
    %23 = arith.select %5, %12, %22 : vector<8x4xi1>, vector<8x4xf32>
    %cst_9 = arith.constant dense<0.000000e+00> : vector<8xf32>
    %24 = vector.multi_reduction <add>, %23, %cst_9 [1] : vector<8x4xf32> to vector<8xf32>
    %25 = vector.shape_cast %24 : vector<8xf32> to vector<8x1xf32>
    %26 = arith.subf %21, %25 : vector<8x1xf32>
    %c1_i32 = arith.constant 1 : i32
    %27 = arith.muli %arg0, %c1_i32 : i32
    %28 = arith.addi %27, %arg1 : i32
    %c8_i32 = arith.constant 8 : i32
    %29 = arith.muli %28, %c8_i32 : i32
    %30 = tpu.iota {dimensions = array<i32: 0>} : vector<8x1xi32>
    %31 = vector.broadcast %29 : i32 to vector<8x1xi32>
    %32 = arith.addi %31, %30 : vector<8x1xi32>
    %c8_i32_10 = arith.constant 8 : i32
    %33 = vector.broadcast %c8_i32_10 : i32 to vector<8x1xi32>
    %34 = arith.cmpi slt, %32, %33 : vector<8x1xi32>
    %cst_11 = arith.constant 0.000000e+00 : f32
    %35 = vector.broadcast %cst_11 : f32 to vector<8x1xf32>
    %36 = arith.select %34, %26, %35 : vector<8x1xi1>, vector<8x1xf32>
    %c0_i32 = arith.constant 0 : i32
    %37 = arith.cmpi eq, %arg1, %c0_i32 : i32
    %38 = arith.extui %37 : i1 to i32
    %c0_i32_12 = arith.constant 0 : i32
    %39 = arith.cmpi ne, %38, %c0_i32_12 : i32
    scf.if %39 {
      %cst_19 = arith.constant 0.000000e+00 : f32
      %46 = vector.broadcast %cst_19 : f32 to vector<8x1xf32>
      %c0_20 = arith.constant 0 : index
      %c0_21 = arith.constant 0 : index
      %47 = vector.load %arg6[%c0_20, %c0_21] : memref<8x1xf32, #tpu.memory_space<vmem>>, vector<8x1xf32>
      tpu.vector_store %arg6[%c0_20, %c0_21], %46 {strides = array<i32>} : memref<8x1xf32, #tpu.memory_space<vmem>>, vector<8x1xf32>,
    } else {
    }
    %c0_13 = arith.constant 0 : index
    %c0_14 = arith.constant 0 : index
    %40 = vector.load %arg6[%c0_13, %c0_14] : memref<8x1xf32, #tpu.memory_space<vmem>>, vector<8x1xf32>
    %41 = arith.addf %40, %36 : vector<8x1xf32>
    %c0_15 = arith.constant 0 : index
    %c0_16 = arith.constant 0 : index
    %42 = vector.load %arg6[%c0_15, %c0_16] : memref<8x1xf32, #tpu.memory_space<vmem>>, vector<8x1xf32>
    tpu.vector_store %arg6[%c0_15, %c0_16], %41 {strides = array<i32>} : memref<8x1xf32, #tpu.memory_space<vmem>>, vector<8x1xf32>,
    %c0_i32_17 = arith.constant 0 : i32
    %43 = arith.cmpi eq, %arg1, %c0_i32_17 : i32
    %44 = arith.extui %43 : i1 to i32
    %c0_i32_18 = arith.constant 0 : i32
    %45 = arith.cmpi ne, %44, %c0_i32_18 : i32
    scf.if %45 {
      %c0_19 = arith.constant 0 : index
      %c0_20 = arith.constant 0 : index
      %46 = vector.load %arg6[%c0_19, %c0_20] : memref<8x1xf32, #tpu.memory_space<vmem>>, vector<8x1xf32>
      %47 = vector.shape_cast %46 : vector<8x1xf32> to vector<1x8x1xf32>
      %cst_21 = arith.constant dense<0.000000e+00> : vector<1xf32>
      %48 = vector.multi_reduction <add>, %47, %cst_21 [1, 2] : vector<1x8x1xf32> to vector<1xf32>
      %49 = vector.shape_cast %48 : vector<1xf32> to vector<1x1x1xf32>
      %50 = vector.extract %49[0, 0, 0] : f32 from vector<1x1x1xf32>
      %c0_22 = arith.constant 0 : index
      %c0_23 = arith.constant 0 : index
      %51 = memref.load %arg5[%c0_22, %c0_23] : memref<1x1xf32, #tpu.memory_space<smem>>
      memref.store %50, %arg5[%c0_22, %c0_23] : memref<1x1xf32, #tpu.memory_space<smem>>
    } else {
    }
    return
  }
  func.func @transform_0(%arg0: i32, %arg1: i32) -> (i32, i32) {
    %c0_i32 = arith.constant 0 : i32
    %c0_i32_0 = arith.constant 0 : i32
    return %arg1, %c0_i32 : i32, i32
  }
  func.func @transform_1(%arg0: i32, %arg1: i32) -> (i32, i32) {
    %c0_i32 = arith.constant 0 : i32
    %c0_i32_0 = arith.constant 0 : i32
    return %arg1, %c0_i32 : i32, i32
  }
  func.func @transform_2(%arg0: i32, %arg1: i32) -> (i32, i32) {
    %c0_i32 = arith.constant 0 : i32
    %c0_i32_0 = arith.constant 0 : i32
    %c0_i32_1 = arith.constant 0 : i32
    return %c0_i32, %c0_i32_0 : i32, i32
  }
  func.func @transform_3(%arg0: i32, %arg1: i32) -> (i32, i32) {
    %c0_i32 = arith.constant 0 : i32
    %c0_i32_0 = arith.constant 0 : i32
    return %arg0, %c0_i32 : i32, i32
  }
}

</mosaic_0001>

<bundles_post_ra>
// kernel: tpu_custom_call.1
= control target key start
LH: loop header
LB: loop body
LE: loop exit
PB: predicated region body
PF: predicated region fallthrough
CT: control target
= control target key end

     0   :  { %v119_v1 = vmov 0   ;;  %s154_s0 = inlined_call_operand.vmem [shape: f32[8,4], index: 0, kind: input, shape index: {}]   ;;  %s155_s1 = inlined_call_operand.vmem [shape: s32[8,1], index: 1, kind: input, shape index: {}]   ;;  %s156_s2 = inlined_call_operand.vmem [shape: f32[1,4], index: 2, kind: input, shape index: {}]   ;;  %s157_s3 = inlined_call_operand.hbm [shape: f32[1,1], index: 3, kind: output, shape index: {}]  }
   0x1   :  { %v16_v0 = vld [vmem:[%s155_s1] sm:$0xff]  ;;  %104 = vset.pattern.permute.xlu0 %v119_v1 }
   0x2   :  { %8 = vsyncpa [#allocation4], 0  ;;  %21 = vperm.xlu0 %104, %v16_v0   ;;  %v18_v2 = vlaneseq  ;;  %v15_v3 = vld [vmem:[%s154_s0] sm:$0xff]  ;;  %vm33_vm1 = vcmask 31744   ;;  %vm63_vm2 = vcmask 7168   ;;  %v120_v18 = vmov 0.0  }
   0x3   :  { %v98_v5 = vld [vmem:[%s156_s2] ss:$0 sm:$0xff]  ;;  %v24_v6 = vmul.f32 30.0, %v15_v3  ;;  %64 = vst.msk [vmem:[#allocation2] sm:$0xff] %vm63_vm2, %v120_v18  ;;  %s121_s1 = smov [#allocation3]  }
   0x4   :  { %v19_v4 = vand.u32 127, %v18_v2 }
   0xa   :  { %v65_v23 = vld [vmem:[#allocation2] sm:$0xff] }
  0x7d   :  { %v22_v7 = vpop.permute.xlu0 %21 }
  0x7e   :  { %vm23_vm0 = vcmp.eq.s32.totalorder %v19_v4, %v22_v7 }
  0x7f   :  { %v31_v8 = vsel %vm23_vm0, %v98_v5, 0.0 }
  0x80   :  { %v32_v9 = vsub.f32 %v24_v6, %v31_v8 }
  0x82   :  { %v34_v10 = vsel %vm33_vm1, %v32_v9, -inf  ;;  %v46_v16 = vsel %vm23_vm0, %v32_v9, 0.0 }
  0x83   :  { %35 = vmax.xlane.f32.xlu0 %v34_v10  ;;  %v47_v17 = vsel %vm33_vm1, %v46_v16, 0.0 }
 0x10c   :  { %v36_v11 = vpop.xlane.xlu0 %35 }
 0x10d   :  { %v37_v12 = vsub.f32 %v32_v9, %v36_v11 }
 0x10f   :  { %v38_v13 = vmul.f32 1.442695, %v37_v12 }
 0x111   :  { %105 = vpow2.f32 %v38_v13 }
 0x11e   :  { %v106_v14 = vpop.eup %105 }
 0x11f   :  { %v40_v15 = vsel %vm33_vm1, %v106_v14, 0.0 }
 0x120   :  { %41 = vadd.xlane.f32.xlu1 %v40_v15 }
 0x124   :  { %48 = vadd.xlane.f32.xlu1 %v47_v17 }
 0x1a9   :  { %v42_v19 = vpop.xlane.xlu1 %41 }
 0x1aa   :  { %107 = vlog2.f32 %v42_v19 }
 0x1ad   :  { %v49_v24 = vpop.xlane.xlu1 %48 }
 0x1b7   :  { %v108_v20 = vpop.eup %107 }
 0x1b8   :  { %v44_v21 = vmul.f32 0.6931472, %v108_v20 }
 0x1ba   :  { %v45_v22 = vadd.f32 %v44_v21, %v36_v11 }
 0x1bc   :  { %v50_v25 = vsub.f32 %v45_v22, %v49_v24 }
 0x1be   :  { %v66_v26 = vadd.f32 %v65_v23, %v50_v25 }
 0x1c0   :  { %68 = vst.msk [vmem:[#allocation2] sm:$0xff] %vm63_vm2, %v66_v26 }
 0x1c7   :  { %v72_v27 = vld [vmem:[#allocation2] sm:$0xff] }
 0x1c8   :  { %v73_v28 = vsel %vm63_vm2, %v72_v27, 0.0 }
 0x1c9   :  { %74 = vadd.xlane.f32.xlu1 %v73_v28 }
 0x252   :  { %v75_v29 = vpop.xlane.xlu1 %74 }
 0x253   :  { %v76_v30 = vrot.slane %v75_v29, 4 }
 0x255   :  { %v77_v31 = vadd.f32 %v76_v30, %v75_v29 }
 0x257   :  { %v78_v32 = vrot.slane %v77_v31, 2 }
 0x259   :  { %v79_v33 = vadd.f32 %v78_v32, %v77_v31 }
 0x25b   :  { %v80_v34 = vrot.slane %v79_v33, 1 }
 0x25d   :  { %v81_v35 = vadd.f32 %v80_v34, %v79_v33 }
 0x25f   :  { %99 = vpush %v81_v35 }
 0x290   :  { %s100_s0 = spop %99 }
 0x291   :  { %84 = sst [smem:[#allocation3]] %s100_s0 }
 0x292   :  { %92 = dma.smem_to_hbm %s121_s1, 16, %s157_s3, [#allocation4]  }
 0x293   :  { %117 = dma.done.wait [#allocation4], 16  }
 0x294   :  { %118 = vsyncadd [#allocation4], 4294967280 }
 0x295   :  { %96 = sfence }
 0x296   :  { %97 = vsyncpa [#allocation4], 1 }

</bundles_post_ra>
